<compile_context>
chip_gen: v7x
topology: tpu7x:2x2x1
jax: 0.10.0
libtpu: 0.0.40
codegen_flags: <defaults>
</compile_context>

<pallas_src>
import functools

import numpy as np

import jax
import jax.numpy as jnp
from jax.experimental import pallas as pl
from jax.experimental.pallas import tpu as pltpu

_HI = jax.lax.Precision.HIGHEST


# ---------------------------------------------------------------------------
# Fused kernel: [1x1 conv + BN + ReLU] -> n_taps row-shifted banded matmuls
# (== 3x3 conv, stride folded into the packed weights) -> BN -> ReLU
# ---------------------------------------------------------------------------
def _convbn_fused_kernel(*refs, bottleneck, n_taps):
    refs = list(refs)
    o_ref = refs.pop()                      # output is last
    x_ref = refs.pop(0)
    if bottleneck:
        w1_ref, s1_ref, b1_ref = refs.pop(0), refs.pop(0), refs.pop(0)
    wb_ref, s2_ref, b2_ref = refs.pop(0), refs.pop(0), refs.pop(0)
    mu_ref = refs.pop(0)                    # mask: zero first row of each image
    md_ref = refs.pop(0) if n_taps == 3 else None  # mask: zero last row
    assert not refs

    cd = wb_ref.dtype                       # compute (MXU operand) dtype
    BR = x_ref.shape[0]                     # packed rows in this block
    x = x_ref[...]

    if bottleneck:
        # 1x1 conv as a block-diagonal matmul + folded BN + ReLU (f32 acc).
        h = jnp.dot(x.astype(cd), w1_ref[...], preferred_element_type=jnp.float32)
        h = jnp.maximum(h * s1_ref[...] + b1_ref[...], 0.0)
    else:
        h = x.astype(jnp.float32)

    # Row-shifted taps via sublane rotate + per-row boundary masks.  This
    # replaces the previous zero-padded VMEM scratch (no extra vst/vld, no
    # misaligned offset-1 store) and also zeroes the rows that would wrap
    # across image boundaries inside a multi-image block.
    h_up = pltpu.roll(h, shift=1, axis=0) * mu_ref[...]        # row j <- h[j-1]
    acc = jnp.dot(h_up.astype(cd), wb_ref[0],
                  preferred_element_type=jnp.float32)
    acc = acc + jnp.dot(h.astype(cd), wb_ref[1],
                        preferred_element_type=jnp.float32)
    if n_taps == 3:
        h_dn = pltpu.roll(h, shift=BR - 1, axis=0) * md_ref[...]  # row j <- h[j+1]
        acc = acc + jnp.dot(h_dn.astype(cd), wb_ref[2],
                            preferred_element_type=jnp.float32)

    y = jnp.maximum(acc * s2_ref[...] + b2_ref[...], 0.0)
    o_ref[...] = y.astype(o_ref.dtype)      # lane-dense, unmasked store


def _pick_bt(N, R, lane_max):
    """Images per grid step: divisor of N, sublane-aligned block, VMEM-capped."""
    valid = [d for d in range(1, N + 1)
             if N % d == 0 and ((d * R) % 8 == 0 or d == N)]
    cap_rows = max(8, (2 << 20) // (4 * lane_max))   # keep one f32 block <~2 MiB

    def score(d):
        rows = d * R
        over_cap = rows > cap_rows
        single_step = (N // d) < 2          # prefer >=2 grid steps (v7x 2 TCs)
        return (over_cap, single_step, abs(rows - 256))

    return min(valid, key=score)


def _fused_call(args, *, bottleneck, n_taps, BR, L_out, out_dtype):
    x_rows = args[0]
    NR, L_in = x_rows.shape
    grid = (NR // BR,)

    def bcast_spec(a):
        zeros = (0,) * a.ndim
        return pl.BlockSpec(a.shape, lambda n, _z=zeros: _z)

    in_specs = [pl.BlockSpec((BR, L_in), lambda n: (n, 0))]
    in_specs += [bcast_spec(a) for a in args[1:]]

    kernel = functools.partial(_convbn_fused_kernel,
                               bottleneck=bottleneck, n_taps=n_taps)

    # VMEM budget from actual buffer arithmetic (double-buffered x/out blocks
    # plus resident packed weights / scales / masks), clamped for v7x's 64 MiB.
    const_bytes = sum(int(a.size) * a.dtype.itemsize for a in args[1:])
    block_bytes = BR * (L_in + L_out) * 4
    vmem_limit = int(1.5 * (2 * block_bytes + 2 * const_bytes)) + (2 << 20)
    vmem_limit = max(16 << 20, min(vmem_limit, 64 << 20))

    wband = args[4] if bottleneck else args[1]
    L_mid = wband.shape[1]
    flops = 2 * NR * n_taps * L_mid * L_out
    if bottleneck:
        flops += 2 * NR * L_in * L_mid
    bytes_accessed = (int(x_rows.size) * x_rows.dtype.itemsize
                      + NR * L_out * np.dtype(out_dtype).itemsize
                      + const_bytes)

    return pl.pallas_call(
        kernel,
        out_shape=jax.ShapeDtypeStruct((NR, L_out), out_dtype),
        grid_spec=pltpu.PrefetchScalarGridSpec(
            num_scalar_prefetch=0,
            grid=grid,
            in_specs=in_specs,
            out_specs=pl.BlockSpec((BR, L_out), lambda n: (n, 0)),
        ),
        compiler_params=pltpu.CompilerParams(
            dimension_semantics=("parallel",),
            vmem_limit_bytes=vmem_limit,
        ),
        cost_estimate=pl.CostEstimate(flops=int(flops), transcendentals=0,
                                      bytes_accessed=int(bytes_accessed)),
    )(*args)


# ---------------------------------------------------------------------------
# Weight packing (one-time wrapper-side glue, exact: 0/1 selection matrices)
# ---------------------------------------------------------------------------
def _blockdiag(w, P):
    # w: (Cin, Cmid) -> block-diagonal (P*Cin, P*Cmid): per-pixel 1x1 conv.
    Cin, Cmid = w.shape
    eye = jnp.asarray(np.eye(P, dtype=np.float32))
    return jnp.einsum('pq,cd->pcqd', eye, w, precision=_HI).reshape(P * Cin, P * Cmid)


def _band_normal_pair(w2, W):
    # w2: (3, 3, C, Cout) as (kh, kw, cin, cout).  h/output rows are packed as
    # PAIRS of image rows; returns 3 taps of shape (2*W*C, 2*W*Cout):
    #   OP[r] = HP[r-1] @ band[0] + HP[r] @ band[1] + HP[r+1] @ band[2]
    C, Cout = w2.shape[2], w2.shape[3]
    S = np.stack([np.eye(W, k=1 - kw, dtype=np.float32) for kw in range(3)])
    TA = np.zeros((2, 2, 3), np.float32); TA[1, 0, 0] = 1
    TB = np.zeros((2, 2, 3), np.float32)
    TB[0, 0, 1] = 1; TB[0, 1, 0] = 1; TB[1, 0, 2] = 1; TB[1, 1, 1] = 1
    TC = np.zeros((2, 2, 3), np.float32); TC[0, 1, 2] = 1
    T = jnp.asarray(np.stack([TA, TB, TC]))          # (tap, src_slot, dst_slot, kh)
    band = jnp.einsum('nsth,kxj,hkcd->nsxctjd', T, jnp.asarray(S), w2,
                      precision=_HI)
    return band.reshape(3, 2 * W * C, 2 * W * Cout)


def _band_down_quad(w2, W):
    # Stride-2 path: h rows packed as QUADS, output rows packed as PAIRS.
    #   OP[r] = HQ[r-1] @ band[0] + HQ[r] @ band[1]
    C, Cout = w2.shape[2], w2.shape[3]
    Wo = W // 2
    Sd = np.zeros((3, W, Wo), np.float32)
    for kw in range(3):
        for j in range(Wo):
            x = 2 * j + kw - 1
            if 0 <= x < W:
                Sd[kw, x, j] = 1.0
    TA = np.zeros((4, 2, 3), np.float32); TA[3, 0, 0] = 1
    TB = np.zeros((4, 2, 3), np.float32)
    TB[0, 0, 1] = 1; TB[1, 0, 2] = 1; TB[1, 1, 0] = 1; TB[2, 1, 1] = 1; TB[3, 1, 2] = 1
    T = jnp.asarray(np.stack([TA, TB]))              # (tap, src_slot, dst_slot, kh)
    band = jnp.einsum('nsth,kxj,hkcd->nsxctjd', T, jnp.asarray(Sd), w2,
                      precision=_HI)
    return band.reshape(2, 4 * W * C, 2 * Wo * Cout)


# ---------------------------------------------------------------------------
# ConvBN forward (wrapper; NCHW in / NCHW out, like the PyTorch module)
# ---------------------------------------------------------------------------
def convbn_forward(x_nchw, params, conv_type, bottleneck=True,
                   compute_dtype=jnp.bfloat16):
    if conv_type not in ("normal", "down"):
        raise ValueError(conv_type)
    N, Cin, H, W = x_nchw.shape
    w2 = params["w2"]                                # (3, 3, nInner, nOut)
    nInner, nOut = w2.shape[2], w2.shape[3]

    x = jnp.transpose(x_nchw, (0, 2, 3, 1))          # NCHW -> NHWC (layout glue)

    if conv_type == "normal":
        assert H % 2 == 0, "pair-packed normal path assumes even H"
        sub, R, Wcols, n_taps = 2, H // 2, W, 3
        wband = _band_normal_pair(w2, W)
    else:
        assert H % 4 == 0 and W % 2 == 0, "quad-packed down path assumes H%4==0, even W"
        sub, R, Wcols, n_taps = 4, H // 4, W // 2, 2
        wband = _band_down_quad(w2, W)

    P = sub * W                                      # pixels per matmul row
    L_in, L_mid, L_out = P * Cin, P * nInner, 2 * Wcols * nOut

    x_rows = x.reshape(N * R, L_in)                  # free reshape of contiguous NHWC

    B_T = _pick_bt(N, R, max(L_in, L_mid, L_out))
    BR = B_T * R

    # Per-row boundary masks for the +/-1 row taps (zero the rolled-in row at
    # the top/bottom of every image packed into a block).
    ar = np.arange(BR)
    mask_up = jnp.asarray((ar % R != 0).astype(np.float32).reshape(BR, 1))
    mask_dn = jnp.asarray((ar % R != R - 1).astype(np.float32).reshape(BR, 1))

    cd = compute_dtype
    wband = wband.astype(cd)
    s2t = jnp.tile(params["scale2"], 2 * Wcols).reshape(1, L_out)
    b2t = jnp.tile(params["bias2"], 2 * Wcols).reshape(1, L_out)

    if bottleneck:
        w1b = _blockdiag(params["w1"], P).astype(cd)  # (P*Cin, P*nInner)
        s1t = jnp.tile(params["scale1"], P).reshape(1, L_mid)
        b1t = jnp.tile(params["bias1"], P).reshape(1, L_mid)
        args = (x_rows, w1b, s1t, b1t, wband, s2t, b2t, mask_up)
    else:
        args = (x_rows, wband, s2t, b2t, mask_up)
    if n_taps == 3:
        args = args + (mask_dn,)

    out = _fused_call(args, bottleneck=bottleneck, n_taps=n_taps,
                      BR=BR, L_out=L_out, out_dtype=x.dtype)

    Ho = 2 * R                                        # = H ('normal') or H//2 ('down')
    y = out.reshape(N, R, 2, Wcols, nOut).reshape(N, Ho, Wcols, nOut)
    return jnp.transpose(y, (0, 3, 1, 2))             # NHWC -> NCHW


# ---------------------------------------------------------------------------
# Deterministic parameter construction (synthetic, no checkpoint)
# ---------------------------------------------------------------------------
def make_params(key, nIn, nOut, bottleneck, bnWidth, eps=1e-5):
    ks = jax.random.split(key, 10)
    p = {}
    nInner = nIn
    if bottleneck:
        nInner = min(nInner, bnWidth * nOut)
        w1_oihw = 0.1 * jax.random.normal(ks[0], (nInner, nIn, 1, 1), jnp.float32)
        g1 = jax.random.uniform(ks[1], (nInner,), jnp.float32, 0.5, 1.5)
        bt1 = 0.1 * jax.random.normal(ks[2], (nInner,), jnp.float32)
        m1 = 0.1 * jax.random.normal(ks[3], (nInner,), jnp.float32)
        v1 = jax.random.uniform(ks[4], (nInner,), jnp.float32, 0.5, 1.5)
        s1 = g1 / jnp.sqrt(v1 + eps)
        p["w1_oihw"] = w1_oihw
        p["w1"] = jnp.transpose(w1_oihw[:, :, 0, 0], (1, 0))    # (nIn, nInner)
        p["scale1"] = s1
        p["bias1"] = bt1 - m1 * s1
    w2_oihw = 0.1 * jax.random.normal(ks[5], (nOut, nInner, 3, 3), jnp.float32)
    g2 = jax.random.uniform(ks[6], (nOut,), jnp.float32, 0.5, 1.5)
    bt2 = 0.1 * jax.random.normal(ks[7], (nOut,), jnp.float32)
    m2 = 0.1 * jax.random.normal(ks[8], (nOut,), jnp.float32)
    v2 = jax.random.uniform(ks[9], (nOut,), jnp.float32, 0.5, 1.5)
    s2 = g2 / jnp.sqrt(v2 + eps)
    p["w2_oihw"] = w2_oihw
    p["w2"] = jnp.transpose(w2_oihw, (2, 3, 1, 0))               # (3,3,nInner,nOut)
    p["scale2"] = s2
    p["bias2"] = bt2 - m2 * s2
    return p


# ---------------------------------------------------------------------------
# Pure-JAX reference (same folded-BN semantics) for the correctness check
# ---------------------------------------------------------------------------
def ref_forward(x_nchw, params, conv_type, bottleneck=True):
    dn = ("NCHW", "OIHW", "NCHW")
    y = x_nchw
    if bottleneck:
        y = jax.lax.conv_general_dilated(
            y, params["w1_oihw"], (1, 1), "VALID",
            dimension_numbers=dn, precision=_HI)
        y = jnp.maximum(y * params["scale1"].reshape(1, -1, 1, 1)
                        + params["bias1"].reshape(1, -1, 1, 1), 0.0)
    stride = 1 if conv_type == "normal" else 2
    y = jax.lax.conv_general_dilated(
        y, params["w2_oihw"], (stride, stride), ((1, 1), (1, 1)),
        dimension_numbers=dn, precision=_HI)
    y = jnp.maximum(y * params["scale2"].reshape(1, -1, 1, 1)
                    + params["bias2"].reshape(1, -1, 1, 1), 0.0)
    return y


if __name__ == "__main__":
    key = jax.random.PRNGKey(0)
    kx, kp_b, kp_nb = jax.random.split(key, 3)

    N, nIn, H, W = 2, 4, 16, 16
    nOut, bnWidth = 8, 2

    x = jax.random.normal(kx, (N, nIn, H, W), jnp.float32)   # NCHW, like PyTorch

    params_b = make_params(kp_b, nIn, nOut, True, bnWidth)    # with bottleneck
    params_nb = make_params(kp_nb, nIn, nOut, False, bnWidth)  # without bottleneck

    configs = []
    for params, bottleneck in ((params_b, True), (params_nb, False)):
        for conv_type in ("normal", "down"):
            configs.append((params, bottleneck, conv_type, jnp.bfloat16))
    # Also exercise the f32-operand path at tight tolerance (validates packing).
    configs.append((params_b, True, "normal", jnp.float32))
    configs.append((params_b, True, "down", jnp.float32))

    for params, bottleneck, conv_type, cd in configs:
        y = convbn_forward(x, params, conv_type, bottleneck, compute_dtype=cd)
        jax.block_until_ready(y)
        y_ref = ref_forward(x, params, conv_type, bottleneck)
        Ho = H if conv_type == "normal" else H // 2
        Wo = W if conv_type == "normal" else W // 2
        assert y.shape == (N, nOut, Ho, Wo), (conv_type, bottleneck, y.shape)
        tol = 3e-2 if cd == jnp.bfloat16 else 2e-3
        err = float(jnp.max(jnp.abs(y - y_ref)))
        assert jnp.allclose(y, y_ref, rtol=tol, atol=tol), (
            conv_type, bottleneck, str(cd), err)

    print("KERNEL_OK")
</pallas_src>

<mosaic_0001>
module attributes {stable_mosaic.version = 11 : i64} {
  func.func @_convbn_fused_kernel(%arg0: i32, %arg1: memref<8x128xf32, #tpu.memory_space<vmem>>, %arg2: memref<128x128xbf16, #tpu.memory_space<vmem>>, %arg3: memref<1x128xf32, #tpu.memory_space<vmem>>, %arg4: memref<1x128xf32, #tpu.memory_space<vmem>>, %arg5: memref<3x128x256xbf16, #tpu.memory_space<vmem>>, %arg6: memref<1x256xf32, #tpu.memory_space<vmem>>, %arg7: memref<1x256xf32, #tpu.memory_space<vmem>>, %arg8: memref<8x1xf32, #tpu.memory_space<vmem>>, %arg9: memref<8x1xf32, #tpu.memory_space<vmem>>, %arg10: memref<8x256xf32, #tpu.memory_space<vmem>>) attributes {dimension_semantics = [#tpu.dimension_semantics<parallel>], iteration_bounds = array<i64: 2>, scalar_prefetch = 0 : i64, scratch_operands = 0 : i64, tpu.core_type = #tpu.core_type<tc>, window_params = [{transform_indices = @transform_0, window_bounds = array<i64: 8, 128>}, {pipeline_mode = #tpu.pipeline_mode<synchronous>, transform_indices = @transform_1, window_bounds = array<i64: 128, 128>}, {pipeline_mode = #tpu.pipeline_mode<synchronous>, transform_indices = @transform_2, window_bounds = array<i64: 1, 128>}, {pipeline_mode = #tpu.pipeline_mode<synchronous>, transform_indices = @transform_3, window_bounds = array<i64: 1, 128>}, {pipeline_mode = #tpu.pipeline_mode<synchronous>, transform_indices = @transform_4, window_bounds = array<i64: 3, 128, 256>}, {pipeline_mode = #tpu.pipeline_mode<synchronous>, transform_indices = @transform_5, window_bounds = array<i64: 1, 256>}, {pipeline_mode = #tpu.pipeline_mode<synchronous>, transform_indices = @transform_6, window_bounds = array<i64: 1, 256>}, {pipeline_mode = #tpu.pipeline_mode<synchronous>, transform_indices = @transform_7, window_bounds = array<i64: 8, 1>}, {pipeline_mode = #tpu.pipeline_mode<synchronous>, transform_indices = @transform_8, window_bounds = array<i64: 8, 1>}, {transform_indices = @transform_9, window_bounds = array<i64: 8, 256>}]} {
    %c0 = arith.constant 0 : index
    %c0_0 = arith.constant 0 : index
    %0 = vector.load %arg1[%c0, %c0_0] : memref<8x128xf32, #tpu.memory_space<vmem>>, vector<8x128xf32>
    %1 = arith.truncf %0 : vector<8x128xf32> to vector<8x128xbf16>
    %c0_1 = arith.constant 0 : index
    %c0_2 = arith.constant 0 : index
    %2 = vector.load %arg2[%c0_1, %c0_2] : memref<128x128xbf16, #tpu.memory_space<vmem>>, vector<128x128xbf16>
    %cst = arith.constant dense<0.000000e+00> : vector<8x128xf32>
    %3 = tpu.matmul %1, %2, %cst {dimension_numbers = #tpu.dot_dimension_numbers<[1], [0], [0], [1], [0, 0, 1, 1], [], []>} : vector<8x128xbf16>, vector<128x128xbf16>, vector<8x128xf32> -> vector<8x128xf32>
    %c0_3 = arith.constant 0 : index
    %c0_4 = arith.constant 0 : index
    %4 = vector.load %arg3[%c0_3, %c0_4] : memref<1x128xf32, #tpu.memory_space<vmem>>, vector<1x128xf32>
    %5 = vector.broadcast %4 : vector<1x128xf32> to vector<8x128xf32>
    %6 = arith.mulf %3, %5 : vector<8x128xf32>
    %c0_5 = arith.constant 0 : index
    %c0_6 = arith.constant 0 : index
    %7 = vector.load %arg4[%c0_5, %c0_6] : memref<1x128xf32, #tpu.memory_space<vmem>>, vector<1x128xf32>
    %8 = vector.broadcast %7 : vector<1x128xf32> to vector<8x128xf32>
    %9 = arith.addf %6, %8 : vector<8x128xf32>
    %cst_7 = arith.constant 0.000000e+00 : f32
    %10 = vector.broadcast %cst_7 : f32 to vector<8x128xf32>
    %11 = arith.maximumf %9, %10 : vector<8x128xf32>
    %c1_i32 = arith.constant 1 : i32
    %12 = tpu.dynamic_rotate %11 by %c1_i32 dim 0 : vector<8x128xf32>, i32 -> vector<8x128xf32>
    %c0_8 = arith.constant 0 : index
    %c0_9 = arith.constant 0 : index
    %13 = vector.load %arg8[%c0_8, %c0_9] : memref<8x1xf32, #tpu.memory_space<vmem>>, vector<8x1xf32>
    %14 = vector.broadcast %13 : vector<8x1xf32> to vector<8x128xf32>
    %15 = arith.mulf %12, %14 : vector<8x128xf32>
    %16 = arith.truncf %15 : vector<8x128xf32> to vector<8x128xbf16>
    %c0_10 = arith.constant 0 : index
    %c0_11 = arith.constant 0 : index
    %c0_12 = arith.constant 0 : index
    %17 = vector.load %arg5[%c0_10, %c0_11, %c0_12] : memref<3x128x256xbf16, #tpu.memory_space<vmem>>, vector<1x128x256xbf16>
    %18 = vector.shape_cast %17 : vector<1x128x256xbf16> to vector<128x256xbf16>
    %cst_13 = arith.constant dense<0.000000e+00> : vector<8x256xf32>
    %19 = tpu.matmul %16, %18, %cst_13 {dimension_numbers = #tpu.dot_dimension_numbers<[1], [0], [0], [1], [0, 0, 1, 1], [], []>} : vector<8x128xbf16>, vector<128x256xbf16>, vector<8x256xf32> -> vector<8x256xf32>
    %20 = arith.truncf %11 : vector<8x128xf32> to vector<8x128xbf16>
    %c1 = arith.constant 1 : index
    %c0_14 = arith.constant 0 : index
    %c0_15 = arith.constant 0 : index
    %21 = vector.load %arg5[%c1, %c0_14, %c0_15] : memref<3x128x256xbf16, #tpu.memory_space<vmem>>, vector<1x128x256xbf16>
    %22 = vector.shape_cast %21 : vector<1x128x256xbf16> to vector<128x256xbf16>
    %cst_16 = arith.constant dense<0.000000e+00> : vector<8x256xf32>
    %23 = tpu.matmul %20, %22, %cst_16 {dimension_numbers = #tpu.dot_dimension_numbers<[1], [0], [0], [1], [0, 0, 1, 1], [], []>} : vector<8x128xbf16>, vector<128x256xbf16>, vector<8x256xf32> -> vector<8x256xf32>
    %24 = arith.addf %19, %23 : vector<8x256xf32>
    %c7_i32 = arith.constant 7 : i32
    %25 = tpu.dynamic_rotate %11 by %c7_i32 dim 0 : vector<8x128xf32>, i32 -> vector<8x128xf32>
    %c0_17 = arith.constant 0 : index
    %c0_18 = arith.constant 0 : index
    %26 = vector.load %arg9[%c0_17, %c0_18] : memref<8x1xf32, #tpu.memory_space<vmem>>, vector<8x1xf32>
    %27 = vector.broadcast %26 : vector<8x1xf32> to vector<8x128xf32>
    %28 = arith.mulf %25, %27 : vector<8x128xf32>
    %29 = arith.truncf %28 : vector<8x128xf32> to vector<8x128xbf16>
    %c2 = arith.constant 2 : index
    %c0_19 = arith.constant 0 : index
    %c0_20 = arith.constant 0 : index
    %30 = vector.load %arg5[%c2, %c0_19, %c0_20] : memref<3x128x256xbf16, #tpu.memory_space<vmem>>, vector<1x128x256xbf16>
    %31 = vector.shape_cast %30 : vector<1x128x256xbf16> to vector<128x256xbf16>
    %cst_21 = arith.constant dense<0.000000e+00> : vector<8x256xf32>
    %32 = tpu.matmul %29, %31, %cst_21 {dimension_numbers = #tpu.dot_dimension_numbers<[1], [0], [0], [1], [0, 0, 1, 1], [], []>} : vector<8x128xbf16>, vector<128x256xbf16>, vector<8x256xf32> -> vector<8x256xf32>
    %33 = arith.addf %24, %32 : vector<8x256xf32>
    %c0_22 = arith.constant 0 : index
    %c0_23 = arith.constant 0 : index
    %34 = vector.load %arg6[%c0_22, %c0_23] : memref<1x256xf32, #tpu.memory_space<vmem>>, vector<1x256xf32>
    %35 = vector.broadcast %34 : vector<1x256xf32> to vector<8x256xf32>
    %36 = arith.mulf %33, %35 : vector<8x256xf32>
    %c0_24 = arith.constant 0 : index
    %c0_25 = arith.constant 0 : index
    %37 = vector.load %arg7[%c0_24, %c0_25] : memref<1x256xf32, #tpu.memory_space<vmem>>, vector<1x256xf32>
    %38 = vector.broadcast %37 : vector<1x256xf32> to vector<8x256xf32>
    %39 = arith.addf %36, %38 : vector<8x256xf32>
    %cst_26 = arith.constant 0.000000e+00 : f32
    %40 = vector.broadcast %cst_26 : f32 to vector<8x256xf32>
    %41 = arith.maximumf %39, %40 : vector<8x256xf32>
    %c0_27 = arith.constant 0 : index
    %c0_28 = arith.constant 0 : index
    %42 = vector.load %arg10[%c0_27, %c0_28] : memref<8x256xf32, #tpu.memory_space<vmem>>, vector<8x256xf32>
    tpu.vector_store %arg10[%c0_27, %c0_28], %41 {strides = array<i32>} : memref<8x256xf32, #tpu.memory_space<vmem>>, vector<8x256xf32>,
    return
  }
  func.func @transform_0(%arg0: i32) -> (i32, i32) {
    %c0_i32 = arith.constant 0 : i32
    %c0_i32_0 = arith.constant 0 : i32
    return %arg0, %c0_i32 : i32, i32
  }
  func.func @transform_1(%arg0: i32) -> (i32, i32) {
    %c0_i32 = arith.constant 0 : i32
    %c0_i32_0 = arith.constant 0 : i32
    %c0_i32_1 = arith.constant 0 : i32
    return %c0_i32, %c0_i32_0 : i32, i32
  }
  func.func @transform_2(%arg0: i32) -> (i32, i32) {
    %c0_i32 = arith.constant 0 : i32
    %c0_i32_0 = arith.constant 0 : i32
    %c0_i32_1 = arith.constant 0 : i32
    return %c0_i32, %c0_i32_0 : i32, i32
  }
  func.func @transform_3(%arg0: i32) -> (i32, i32) {
    %c0_i32 = arith.constant 0 : i32
    %c0_i32_0 = arith.constant 0 : i32
    %c0_i32_1 = arith.constant 0 : i32
    return %c0_i32, %c0_i32_0 : i32, i32
  }
  func.func @transform_4(%arg0: i32) -> (i32, i32, i32) {
    %c0_i32 = arith.constant 0 : i32
    %c0_i32_0 = arith.constant 0 : i32
    %c0_i32_1 = arith.constant 0 : i32
    %c0_i32_2 = arith.constant 0 : i32
    return %c0_i32, %c0_i32_0, %c0_i32_1 : i32, i32, i32
  }
  func.func @transform_5(%arg0: i32) -> (i32, i32) {
    %c0_i32 = arith.constant 0 : i32
    %c0_i32_0 = arith.constant 0 : i32
    %c0_i32_1 = arith.constant 0 : i32
    return %c0_i32, %c0_i32_0 : i32, i32
  }
  func.func @transform_6(%arg0: i32) -> (i32, i32) {
    %c0_i32 = arith.constant 0 : i32
    %c0_i32_0 = arith.constant 0 : i32
    %c0_i32_1 = arith.constant 0 : i32
    return %c0_i32, %c0_i32_0 : i32, i32
  }
  func.func @transform_7(%arg0: i32) -> (i32, i32) {
    %c0_i32 = arith.constant 0 : i32
    %c0_i32_0 = arith.constant 0 : i32
    %c0_i32_1 = arith.constant 0 : i32
    return %c0_i32, %c0_i32_0 : i32, i32
  }
  func.func @transform_8(%arg0: i32) -> (i32, i32) {
    %c0_i32 = arith.constant 0 : i32
    %c0_i32_0 = arith.constant 0 : i32
    %c0_i32_1 = arith.constant 0 : i32
    return %c0_i32, %c0_i32_0 : i32, i32
  }
  func.func @transform_9(%arg0: i32) -> (i32, i32) {
    %c0_i32 = arith.constant 0 : i32
    %c0_i32_0 = arith.constant 0 : i32
    return %arg0, %c0_i32 : i32, i32
  }
}

</mosaic_0001>

<bundles_post_ra>
// kernel: tpu_custom_call.1
= control target key start
LH: loop header
LB: loop body
LE: loop exit
PB: predicated region body
PF: predicated region fallthrough
CT: control target
= control target key end

     0   :  { %14 = vsyncpa [#allocation3], 0  ;;  %s1683_s0 = inlined_call_operand.vmem [shape: f32[16,128], index: 0, kind: input, shape index: {}]   ;;  %s1684_s1 = inlined_call_operand.hbm [shape: bf16[128,128], index: 1, kind: input, shape index: {}]   ;;  %s1685_s2 = inlined_call_operand.vmem [shape: f32[1,128], index: 2, kind: input, shape index: {}]   ;;  %s1686_s3 = inlined_call_operand.vmem [shape: f32[1,128], index: 3, kind: input, shape index: {}]   ;;  %s1687_s4 = inlined_call_operand.hbm [shape: bf16[3,128,256], index: 4, kind: input, shape index: {}]   ;;  %s1688_s5 = inlined_call_operand.vmem [shape: f32[1,256], index: 5, kind: input, shape index: {}]   ;;  %s1689_s6 = inlined_call_operand.vmem [shape: f32[1,256], index: 6, kind: input, shape index: {}]   ;;  %s1690_s7 = inlined_call_operand.vmem [shape: f32[8,1], index: 7, kind: input, shape index: {}]   ;;  %s1691_s8 = inlined_call_operand.vmem [shape: f32[8,1], index: 8, kind: input, shape index: {}]   ;;  %s1692_s9 = inlined_call_operand.hbm [shape: f32[16,256], index: 9, kind: output, shape index: {}]  }
   0x1   :  { %15 = vsyncpa [#allocation6], 0 }
   0x2   :  { %16 = vsyncpa [#allocation4], 0 }
   0x3   :  { %18 = vsyncpa [#allocation4 + $0x1], 0  ;;  %s1489_s30 = smov 0   ;;  %s1491_s10 = smov 0  }
   0x4   :  { %s1493_s11 = smov 0   ;;  %s1495_s12 = smov 0  }
   0x5 LB: > { %1699 = sst [smem:[#allocation11_spill]] %s1423_s11  ;;  %s1510_s13 = sadd.s32 4294967295, %s1427_s12   ;;  %s1427_s12 = sphi %s1495_s12, %s1713_s12   ;;  %s1423_s11 = sphi %s1493_s11, %s1715_s11   ;;  %s1419_s10 = sphi %s1491_s10, %s1717_s10   ;;  %s1415_s30 = sphi %s1489_s30, %s1716_s30  }
   0x6   : > { %s1044_s14 = sadd.s32 4294967294, %s1427_s12   ;;  %s1514_s15 = sadd.s32 1, %s1427_s12  }
   0x7   : > { %1700 = sst [smem:[#allocation12_spill]] %s1514_s15  ;;  %s225_s16 = sadd.s32 1, %s1423_s11 }
   0x8   : > { %s222_s17 = ssub.s32 %s1427_s12, %s1514_s15  ;;  %p235_p0 = scmp.ne.s32.totalorder %s1423_s11, %s1419_s10 }
   0x9   : > { %p223_p1 = scmp.eq.s32.totalorder %s222_s17, 0  ;;  %p236_p2 = scmp.eq.s32.totalorder %s1510_s13, 1 }
   0xa   : > { %p241_p3 = scmp.ne.s32.totalorder %s1419_s10, %s1415_s30  ;;  %p242_p4 = scmp.eq.s32.totalorder %s1044_s14, 1 }
   0xb   : > { %s1525_s18 = scalar_select %p223_p1, %s1423_s11, %s225_s16  }
   0xc   : > { %p1527_p5 = por %p236_p2, %p235_p0  ;;  %p1531_p6 = por %p242_p4, %p241_p3 }
   0xd   : > { %1701 = sst [smem:[#allocation13_spill]] %s1525_s18  ;;  %p1045_p7 = scmp.ge.s32.totalorder %s1427_s12, 1 }
   0xe   : > { %s1702_s19 = scalar_select %p1527_p5, 1, 0 }
   0xf   : > { %s1703_s20 = scalar_select %p1531_p6, 1, 0 }
  0x10   : > { %p249_p8 = scmp.lt.s32.totalorder %s1427_s12, 3  ;;  %p1693_p9 = scmp.eq.s32.totalorder %s1510_s13, 0 }
  0x11   : > { %s1429_s22 = smov [#allocation2]   ;;  %s1430_s25 = smov [#allocation5]  }
  0x12   : > { %p1538_p10 = pnand %p1045_p7, %p249_p8  ;;  %s261_s23 = sshll.u32 %s1429_s22, 4  ;;  %s262_s23 = int_to_ptr.vmem [resolvable:$true] %s261_s23 }
  0x13   : > { %s280_s26 = sshll.u32 %s1430_s25, 4  ;;  %s1301_s29 = scalar_lea.hbm %s1684_s1, 1024  ;;  %s1550_s26 = int_to_ptr.vmem [resolvable:$true] %s280_s26 }
  0x14   : > { %s1704_s21 = scalar_select %p1538_p10, 1, 0 }
  0x15   : > { %p1163_p11 = pneg %p1538_p10  ;;  %p1302_p13 = scmp.ne.s32.totalorder %s1684_s1, %s1301_s29 }
  0x16   : > { %p1308_p3 = scmp.lt.u32.totalorder %s1301_s29, %s1684_s1 }
  0x17   : > { %p1546_p12 = pnand %p1693_p9, %p1163_p11 }
  0x19   : > { %p1303_p0 = pneg %p1546_p12 }
  0x1b   : > { %p1304_p1 = pnand %p1303_p0, %p1302_p13 }
  0x1d   : > { %p1305_p2 = pneg %p1304_p1 }
  0x1f   : > { %p1310_p4 = pnand %p1308_p3, %p1305_p2 }
  0x21   : > { %1313 = shalt.err (!%p1310_p4)
}
  0x22   : > { %s1314_s25 = scalar_lea.vmem %s262_s23, 1024  ;;  %p1322_p9 = scmp.lt.s32.totalorder %s262_s23, %s262_s23 }
  0x23   : > { %p1315_p7 = scmp.ne.s32.totalorder %s262_s23, %s1314_s25  ;;  %p1323_p6 = scmp.lt.s32.totalorder %s1314_s25, %s1314_s25 }
  0x25   : > { %p1317_p8 = pnand %p1315_p7, %p1303_p0  ;;  %p1324_p5 = por %p1323_p6, %p1322_p9 }
  0x27   : > { %p1318_p11 = pneg %p1317_p8 }
  0x29   : > { %p1325_p10 = pnand %p1324_p5, %p1318_p11 }
  0x2b   : > { %1328 = shalt.err (!%p1325_p10)
}
  0x2c   : > { %s1431_s27 = smov 64   ;;  %s1432_s28 = smov 4  }
  0x2d   : > { %1166 = dma.hbm_to_vmem [thread:$0]  (!%p1546_p12), %s1684_s1, 1024, %s262_s23, [#allocation3], %s1431_s27, %s1431_s27, %s1432_s28  }
  0x2e   : > { %s1329_s22 = scalar_lea.hbm %s1687_s4, 6144 }
  0x2f   : > { %p1330_p13 = scmp.ne.s32.totalorder %s1687_s4, %s1329_s22  ;;  %p1336_p9 = scmp.lt.u32.totalorder %s1329_s22, %s1687_s4 }
  0x31   : > { %p1332_p5 = pnand %p1330_p13, %p1303_p0 }
  0x33   : > { %p1333_p6 = pneg %p1332_p5 }
  0x35   : > { %p1338_p10 = pnand %p1336_p9, %p1333_p6 }
  0x37   : > { %1341 = shalt.err (!%p1338_p10)
}
  0x38   : > { %s1342_s23 = scalar_lea.vmem %s1550_s26, 6144  ;;  %p1350_p4 = scmp.lt.s32.totalorder %s1550_s26, %s1550_s26 }
  0x39   : > { %p1343_p1 = scmp.ne.s32.totalorder %s1550_s26, %s1342_s23  ;;  %p1351_p7 = scmp.lt.s32.totalorder %s1342_s23, %s1342_s23 }
  0x3b   : > { %p1345_p2 = pnand %p1343_p1, %p1303_p0  ;;  %p1352_p8 = por %p1351_p7, %p1350_p4 }
  0x3d   : > { %p1346_p3 = pneg %p1345_p2 }
  0x3f   : > { %p1353_p11 = pnand %p1352_p8, %p1346_p3 }
  0x41   : > { %1356 = shalt.err (!%p1353_p11)
}
  0x42   : > { %s1433_s11 = smov 128   ;;  %s1434_s15 = smov 8  }
  0x43   : > { %1169 = dma.hbm_to_vmem [thread:$0]  (!%p1546_p12), %s1687_s4, 6144, %s1550_s26, [#allocation6], %s1433_s11, %s1433_s11, %s1434_s15  }
  0x44   : > { %p1706_p13 = scmp.ne.s32.totalorder %s1704_s21, 0 }
  0x45   : > { %p1707_p0 = scmp.eq.s32.totalorder (!%p1706_p13), %s1510_s13, 0 }
  0x46   : > { %315 = sbr.rel (%p1706_p13) target bundleno = 606 (0x25e), region = 56 }
  0x4d   : > { %1402 = dma.done.wait (%p1707_p0), [#allocation3], 1024   ;;  %p1708_p5 = pmov %p1707_p0 }
  0x4e   : > { %p1709_p6 = pmov %p1707_p0 }
  0x4f   : > { %1404 = vsyncadd (%p1708_p5), [#allocation3], 4294966272 }
  0x50   : > { %1406 = dma.done.wait (%p1709_p6), [#allocation6], 6144   ;;  %p1710_p9 = pmov %p1707_p0 }
  0x51   : > { %v1435_v0 = vmov 0.0   ;;  %vm1436_vm0 = vmmov 0   ;;  %v1437_v1 = vmov 0   ;;  %v1221_v2 = vld [vmem:[#allocation2] sm:$0xff]   ;;  %v1222_v3 = vld [vmem:[#allocation2 + $0x8] sm:$0xff]   ;;  %v1223_v4 = vld [vmem:[#allocation2 + $0x10] sm:$0xff]  }
  0x52   : > { %1408 = vsyncadd (%p1710_p9), [#allocation6], 4294961152  ;;  %1127 = vmatprep.subr.bf16.mxu0 %v1435_v0  ;;  %1143 = vmatprep.mubr.msk.bf16.mxu0 %vm1436_vm0, %v1435_v0  ;;  %v483_v5 = vld [vmem:[%s1690_s7] sm:$0xff]  ;;  %v1224_v6 = vld [vmem:[#allocation2 + $0x18] sm:$0xff]   ;;  %p354_p12 = scmp.lt.s32.totalorder %s1510_s13, 1  ;;  %s351_s21 = sand.u32 1, %s1419_s10  }
  0x53   : > { %1220 = vset.pattern.permute.xlu0 %v1437_v1  ;;  %758 = vmatprep.mubr.bf16.mxu1 %v1437_v1  ;;  %v768_v7 = vld [vmem:[%s1691_s8] sm:$0xff]  ;;  %v1238_v10 = vld [vmem:[#allocation5 + $0x14] ss:$8 sps:$4 sm:$0xff]   ;;  %v1243_v12 = vld [vmem:[#allocation5 + $0x10] ss:$8 sps:$4 sm:$0xff]   ;;  %s1052_s28 = sshll.u32 %s351_s21, 4 }
  0x54   : > { %1128 = vmatpush3.bf16.msra.mxu0 %v1221_v2  ;;  %486 = vperm.xlu0 %1220, %v483_v5   ;;  %v1232_v8 = vld [vmem:[#allocation5 + $0x4] ss:$8 sps:$4 sm:$0xff]   ;;  %v1237_v9 = vld [vmem:[#allocation5] ss:$8 sps:$4 sm:$0xff]   ;;  %s355_s29 = scalar_select %p354_p12, %s1510_s13, 1  ;;  %v1227_v17 = vld [vmem:[#allocation2 + $0x30] sm:$0xff]  }
  0x55   : > { %1129 = vmatprep.subr.bf16.mxu0 %v1435_v0  ;;  %726 = vmatprep.subr.bf16.mxu1 %v1232_v8  ;;  %v1225_v11 = vld [vmem:[#allocation2 + $0x20] sm:$0xff]   ;;  %v1226_v14 = vld [vmem:[#allocation2 + $0x28] sm:$0xff]   ;;  %v1250_v16 = vld [vmem:[#allocation5 + $0x34] ss:$8 sps:$4 sm:$0xff]   ;;  %s949_s23 = scalar_lea.sflag [#allocation4], %s351_s21  ;;  %p1711_p1 = scmp.ne.s32.totalorder %s1702_s19, 0 }
  0x56   : > { %727 = vmatpush1.bf16.msra.mxu1 %v1237_v9  ;;  %v1244_v13 = vld [vmem:[#allocation5 + $0x24] ss:$8 sps:$4 sm:$0xff]   ;;  %s1053_s14 = sshll.u32 %s355_s29, 3  ;;  %v1249_v15 = vld [vmem:[#allocation5 + $0x20] ss:$8 sps:$4 sm:$0xff]   ;;  %v1228_v20 = vld [vmem:[#allocation2 + $0x38] sm:$0xff]  }
  0x57   : > { %728 = vmatprep.subr.bf16.mxu1 %v1238_v10  ;;  %s357_s22 = scalar_lea.vmem %s1683_s0, %s1053_s14  ;;  %v1255_v18 = vld [vmem:[#allocation5 + $0x30] ss:$8 sps:$4 sm:$0xff]   ;;  %v1256_v19 = vld [vmem:[#allocation5 + $0x44] ss:$8 sps:$4 sm:$0xff]   ;;  %v1261_v22 = vld [vmem:[#allocation5 + $0x40] ss:$8 sps:$4 sm:$0xff]  }
  0x58   : > { %1130 = vmatpush3.bf16.msra.mxu0 %v1222_v3  ;;  %771 = vperm.xlu0 %1220, %v768_v7   ;;  %v359_v21 = vld [vmem:[%s357_s22] sm:$0xff]  ;;  %v1236_v26 = vld [vmem:[#allocation5 + $0x94] ss:$8 sps:$4 sm:$0xff]   ;;  %v1234_v27 = vld [vmem:[#allocation5 + $0x90] ss:$8 sps:$4 sm:$0xff]   ;;  %s1117_s29 = sshll.u32 %s1510_s13, 8 }
  0x59   : > { %1131 = vmatprep.subr.bf16.mxu0 %v1435_v0  ;;  %v1231_v23 = vld [vmem:[#allocation5 + $0x84] ss:$8 sps:$4 sm:$0xff]   ;;  %v1229_v24 = vld [vmem:[#allocation5 + $0x80] ss:$8 sps:$4 sm:$0xff]   ;;  %v360_v25 = vpack.c.bf16 %v359_v21, %v359_v21  ;;  %v1248_v30 = vld [vmem:[#allocation5 + $0xb4] ss:$8 sps:$4 sm:$0xff]   ;;  %s1641_s25 = scalar_lea.hbm %s1692_s9, %s1117_s29 }
  0x5a   : > { %729 = vmatpush1.bf16.msra.mxu1 %v1243_v12  ;;  %v1242_v28 = vld [vmem:[#allocation5 + $0xa4] ss:$8 sps:$4 sm:$0xff]   ;;  %v1240_v29 = vld [vmem:[#allocation5 + $0xa0] ss:$8 sps:$4 sm:$0xff]   ;;  %v1246_v31 = vld [vmem:[#allocation5 + $0xb0] ss:$8 sps:$4 sm:$0xff]  }
  0x5b   : > { %730 = vmatprep.subr.bf16.mxu1 %v1244_v13  ;;  %v1254_v32 = vld [vmem:[#allocation5 + $0xc4] ss:$8 sps:$4 sm:$0xff]   ;;  %v1252_v33 = vld [vmem:[#allocation5 + $0xc0] ss:$8 sps:$4 sm:$0xff]   ;;  %v1260_v34 = vld [vmem:[#allocation5 + $0xd4] ss:$8 sps:$4 sm:$0xff]  }
  0x5c   : > { %1132 = vmatpush3.bf16.msra.mxu0 %v1223_v4  ;;  %v1258_v35 = vld [vmem:[#allocation5 + $0xd0] ss:$8 sps:$4 sm:$0xff]   ;;  %v1262_v36 = vld [vmem:[#allocation5 + $0x54] ss:$8 sps:$4 sm:$0xff]   ;;  %v1266_v37 = vld [vmem:[#allocation5 + $0xe4] ss:$8 sps:$4 sm:$0xff]  }
  0x5d   : > { %1133 = vmatprep.subr.bf16.mxu0 %v1435_v0  ;;  %v1267_v38 = vld [vmem:[#allocation5 + $0x50] ss:$8 sps:$4 sm:$0xff]   ;;  %v1264_v39 = vld [vmem:[#allocation5 + $0xe0] ss:$8 sps:$4 sm:$0xff]   ;;  %v1268_v40 = vld [vmem:[#allocation5 + $0x64] ss:$8 sps:$4 sm:$0xff]  }
  0x5e   : > { %731 = vmatpush1.bf16.msra.mxu1 %v1249_v15  ;;  %v1272_v41 = vld [vmem:[#allocation5 + $0xf4] ss:$8 sps:$4 sm:$0xff]   ;;  %v1273_v42 = vld [vmem:[#allocation5 + $0x60] ss:$8 sps:$4 sm:$0xff]   ;;  %v1270_v43 = vld [vmem:[#allocation5 + $0xf0] ss:$8 sps:$4 sm:$0xff]  }
  0x5f   : > { %732 = vmatprep.subr.bf16.mxu1 %v1250_v16  ;;  %v1274_v44 = vld [vmem:[#allocation5 + $0x74] ss:$8 sps:$4 sm:$0xff]   ;;  %v1276_v45 = vld [vmem:[#allocation5 + $0x70] ss:$8 sps:$4 sm:$0xff]   ;;  %v1279_v46 = vld [vmem:[#allocation5 + $0x104] ss:$8 sps:$4 sm:$0xff]  }
  0x60   : > { %1134 = vmatpush3.bf16.msra.mxu0 %v1224_v6  ;;  %v1062_v47 = vld [vmem:[%s1685_s2] ss:$0 sm:$0xff]  ;;  %v1282_v62 = vld [vmem:[#allocation5 + $0x114] ss:$8 sps:$4 sm:$0xff]   ;;  %v1280_v63 = vld [vmem:[#allocation5 + $0x110] ss:$8 sps:$4 sm:$0xff]  }
  0x61   : > { %1135 = vmatprep.subr.bf16.mxu0 %v1435_v0  ;;  %v1063_v49 = vld [vmem:[%s1686_s3] ss:$0 sm:$0xff]  ;;  %v1288_v3 = vld [vmem:[#allocation5 + $0x134] ss:$8 sps:$4 sm:$0xff]   ;;  %v1286_v4 = vld [vmem:[#allocation5 + $0x130] ss:$8 sps:$4 sm:$0xff]  }
  0x62   : > { %733 = vmatpush1.bf16.msra.mxu1 %v1255_v18  ;;  %v1277_v60 = vld [vmem:[#allocation5 + $0x100] ss:$8 sps:$4 sm:$0xff]   ;;  %v1291_v5 = vld [vmem:[#allocation5 + $0x144] ss:$8 sps:$4 sm:$0xff]   ;;  %v1294_v7 = vld [vmem:[#allocation5 + $0x154] ss:$8 sps:$4 sm:$0xff]  }
  0x63   : > { %734 = vmatprep.subr.bf16.mxu1 %v1256_v19  ;;  %v1283_v2 = vld [vmem:[#allocation5 + $0x120] ss:$8 sps:$4 sm:$0xff]   ;;  %v1292_v8 = vld [vmem:[#allocation5 + $0x150] ss:$8 sps:$4 sm:$0xff]   ;;  %v1297_v9 = vld [vmem:[#allocation5 + $0x164] ss:$8 sps:$4 sm:$0xff]  }
  0x64   : > { %1136 = vmatpush3.bf16.msra.mxu0 %v1225_v11  ;;  %v1289_v6 = vld [vmem:[#allocation5 + $0x140] ss:$8 sps:$4 sm:$0xff]   ;;  %v1300_v11 = vld [vmem:[#allocation5 + $0x174] ss:$8 sps:$4 sm:$0xff]   ;;  %v1298_v13 = vld [vmem:[#allocation5 + $0x170] ss:$8 sps:$4 sm:$0xff]  }
  0x65   : > { %1137 = vmatprep.subr.bf16.mxu0 %v1435_v0  ;;  %s353_s14 = scalar_lea.vmem [#allocation7], %s1052_s28  ;;  %s1438_s13 = smov [#allocation7]  }
  0x66   : > { %735 = vmatpush1.bf16.msra.mxu1 %v1261_v22  ;;  %s963_s16 = sshll.u32 %s353_s14, 4  ;;  %s1361_s15 = sshll.u32 %s1438_s13, 4  ;;  %s1643_s16 = int_to_ptr.vmem [resolvable:$true] %s963_s16  ;;  %s1362_s15 = int_to_ptr.vmem [resolvable:$false] %s1361_s15 }
  0x67   : > { %736 = vmatprep.subr.bf16.mxu1 %v1262_v36  ;;  %s1357_s11 = scalar_lea.vmem %s1643_s16, 256  ;;  %s1363_s18 = scalar_lea.vmem %s1362_s15, 512 }
  0x68   : > { %1138 = vmatpush3.bf16.msra.mxu0 %v1226_v14  ;;  %p1358_p10 = scmp.ne.s32.totalorder %s1643_s16, %s1357_s11  ;;  %p1364_p4 = scmp.lt.s32.totalorder %s1643_s16, %s1362_s15 }
  0x69   : > { %1139 = vmatprep.subr.bf16.mxu0 %v1435_v0  ;;  %p1365_p7 = scmp.lt.s32.totalorder %s1363_s18, %s1357_s11 }
  0x6a   : > { %737 = vmatpush1.bf16.msra.mxu1 %v1267_v38  ;;  %p1359_p2 = pnand %p1358_p10, %p1711_p1 }
  0x6b   : > { %738 = vmatprep.subr.bf16.mxu1 %v1268_v40  ;;  %p1366_p8 = por %p1365_p7, %p1364_p4 }
  0x6c   : > { %1140 = vmatpush3.bf16.msra.mxu0 %v1227_v17  ;;  %p1360_p3 = pneg %p1359_p2 }
  0x6d   : > { %1141 = vmatprep.subr.bf16.mxu0 %v1435_v0  ;;  %v1285_v0 = vld [vmem:[#allocation5 + $0x124] ss:$8 sps:$4 sm:$0xff]  }
  0x6e   : > { %739 = vmatpush1.bf16.msra.mxu1 %v1273_v42  ;;  %p1367_p11 = pnand %p1366_p8, %p1360_p3 }
  0x6f   : > { %740 = vmatprep.subr.bf16.mxu1 %v1274_v44 }
  0x70   : > { %1142 = vmatpush3.bf16.msra.mxu0 %v1228_v20  ;;  %v918_v20 = vlaneseq }
  0x71   : > { %605 = vmatprep.subr.bf16.mxu0 %v1231_v23  ;;  %v916_v23 = vld [vmem:[%s1688_s5] sm:$0x3] }
  0x72   : > { %741 = vmatpush1.bf16.msra.mxu1 %v1276_v45  ;;  %v919_v21 = vshrl.u32 %v918_v20, 7 }
  0x73   : > { %1144 = vmatmul.mubr.bf16.vlgmr.msra.gmra.mrb[0].mxu0 %v360_v25  ;;  %873 = vmatprep.subr.bf16.mxu1 %v1279_v46  ;;  %v930_v25 = vld [vmem:[%s1689_s6] sm:$0x3] }
  0x74   : > { %606 = vmatpush1.bf16.msra.mxu0 %v1229_v24  ;;  %637 = vmatprep.mubr.bf16.mxu0 %v1437_v1  ;;  %v920_v22 = vsub.s32 0, %v919_v21  ;;  %v924_v24 = vsub.s32 1, %v919_v21 }
  0x75   : > { %607 = vmatprep.subr.bf16.mxu0 %v1236_v26 }
  0x76   : > { %v921_v26 = vrot.slane %v916_v23, %v920_v22 }
  0x78   : > { %608 = vmatpush1.bf16.msra.mxu0 %v1234_v27 }
  0x79   : > { %609 = vmatprep.subr.bf16.mxu0 %v1242_v28  ;;  %v925_v28 = vrot.slane %v916_v23, %v924_v24 }
  0x7c   : > { %610 = vmatpush1.bf16.msra.mxu0 %v1240_v29 }
  0x7d   : > { %611 = vmatprep.subr.bf16.mxu0 %v1248_v30  ;;  %v935_v30 = vrot.slane %v930_v25, %v920_v22 }
  0x80   : > { %612 = vmatpush1.bf16.msra.mxu0 %v1246_v31 }
  0x81   : > { %613 = vmatprep.subr.bf16.mxu0 %v1254_v32 }
  0x84   : > { %614 = vmatpush1.bf16.msra.mxu0 %v1252_v33  ;;  %v939_v33 = vrot.slane %v930_v25, %v924_v24 }
  0x85   : > { %615 = vmatprep.subr.bf16.mxu0 %v1260_v34 }
  0x88   : > { %616 = vmatpush1.bf16.msra.mxu0 %v1258_v35 }
  0x89   : > { %617 = vmatprep.subr.bf16.mxu0 %v1266_v37 }
  0x8c   : > { %618 = vmatpush1.bf16.msra.mxu0 %v1264_v39 }
  0x8d   : > { %619 = vmatprep.subr.bf16.mxu0 %v1272_v41 }
  0x90   : > { %620 = vmatpush1.bf16.msra.mxu0 %v1270_v43 }
  0xd3   : > { %v487_v58 = vpop.permute.xlu0 %486 }
  0xd7   : > { %v772_v12 = vpop.permute.xlu0 %771 }
 0x146   : > { %v459_v48 = vpop.f32.mrb[0].mxu0 }
 0x147   : > { %v472_v50 = vmul.f32 %v1062_v47, %v459_v48  ;;  %v1145_v51 = vpop.f32.mrb[1].mxu0 }
 0x148   : > { %v462_v52 = vpop.f32.mrb[2].mxu0 }
 0x149   : > { %v480_v53 = vadd.f32 %v1063_v49, %v472_v50  ;;  %v1146_v54 = vpop.f32.mrb[3].mxu0 }
 0x14b   : > { %v481_v55 = vmax.f32 %v480_v53, 0.0 }
 0x14d   : > { %v482_v56 = vrot.slane %v481_v55, 7  ;;  %v507_v57 = vpack.c.bf16 %v481_v55, %v481_v55  ;;  %v767_v10 = vrot.slane %v481_v55, 1 }
 0x14f   : > { %v489_v59 = vmul.f32 %v487_v58, %v482_v56  ;;  %638 = vmatmul.mubr.bf16.vlgmr.msra.gmra.mrb[4].mxu0 %v507_v57  ;;  %v774_v14 = vmul.f32 %v772_v12, %v767_v10 }
 0x151   : > { %v490_v61 = vpack.c.bf16 %v489_v59, %v489_v59  ;;  %v775_v15 = vpack.c.bf16 %v774_v14, %v774_v14 }
 0x153   : > { %759 = vmatmul.mubr.bf16.vlgmr.msra.gmra.mrb[0].mxu1 %v490_v61 }
 0x154   : > { %874 = vmatpush1.bf16.msra.mxu1 %v1277_v60  ;;  %905 = vmatprep.mubr.bf16.mxu1 %v1437_v1  ;;  %v1295_v1 = vld [vmem:[#allocation5 + $0x160] ss:$8 sps:$4 sm:$0xff]  }
 0x155   : > { %875 = vmatprep.subr.bf16.mxu1 %v1282_v62 }
 0x158   : > { %876 = vmatpush1.bf16.msra.mxu1 %v1280_v63 }
 0x159   : > { %877 = vmatprep.subr.bf16.mxu1 %v1285_v0 }
 0x15c   : > { %878 = vmatpush1.bf16.msra.mxu1 %v1283_v2 }
 0x15d   : > { %879 = vmatprep.subr.bf16.mxu1 %v1288_v3 }
 0x160   : > { %880 = vmatpush1.bf16.msra.mxu1 %v1286_v4 }
 0x161   : > { %881 = vmatprep.subr.bf16.mxu1 %v1291_v5 }
 0x164   : > { %882 = vmatpush1.bf16.msra.mxu1 %v1289_v6 }
 0x165   : > { %883 = vmatprep.subr.bf16.mxu1 %v1294_v7 }
 0x168   : > { %884 = vmatpush1.bf16.msra.mxu1 %v1292_v8 }
 0x169   : > { %885 = vmatprep.subr.bf16.mxu1 %v1297_v9 }
 0x16c   : > { %886 = vmatpush1.bf16.msra.mxu1 %v1295_v1 }
 0x16d   : > { %887 = vmatprep.subr.bf16.mxu1 %v1300_v11 }
 0x170   : > { %888 = vmatpush1.bf16.msra.mxu1 %v1298_v13 }
 0x173   : > { %906 = vmatmul.mubr.bf16.vlgmr.msra.gmra.mrb[0].mxu1 %v775_v15 }
 0x222   : > { %v639_v16 = vpop.f32.mrb[4].mxu0 }
 0x223   : > { %v641_v17 = vpop.f32.mrb[5].mxu0 }
 0x224   : > { %v643_v18 = vpop.f32.mrb[6].mxu0 }
 0x225   : > { %v644_v19 = vpop.f32.mrb[7].mxu0 }
 0x246   : > { %v907_v27 = vpop.f32.mrb[0].mxu1 }
 0x247   : > { %v1147_v29 = vadd.f32 %v907_v27, %v639_v16  ;;  %v909_v31 = vpop.f32.mrb[1].mxu1 }
 0x248   : > { %v1148_v32 = vadd.f32 %v909_v31, %v641_v17  ;;  %v911_v34 = vpop.f32.mrb[2].mxu1 }
 0x249   : > { %v928_v35 = vmul.f32 %v1147_v29, %v921_v26  ;;  %v912_v36 = vpop.f32.mrb[3].mxu1 }
 0x24a   : > { %v929_v37 = vmul.f32 %v1148_v32, %v925_v28 }
 0x24b   : > { %v942_v38 = vadd.f32 %v935_v30, %v928_v35 }
 0x24c   : > { %v943_v39 = vadd.f32 %v939_v33, %v929_v37 }
 0x24d   : > { %v944_v40 = vmax.f32 %v942_v38, 0.0 }
 0x24e   : > { %v945_v41 = vmax.f32 %v943_v39, 0.0 }
 0x24f   : > { %946 = vst [vmem:[%s353_s14] sm:$0xff] %v944_v40 }
 0x250   : > { %947 = vst [vmem:[%s353_s14 + $0x8] sm:$0xff] %v945_v41 }
 0x251   : > { %1370 = shalt.err (!%p1367_p11)
}
 0x252   : > { %s1371_s27 = scalar_lea.hbm %s1641_s25, 256  ;;  %s1375_s26 = scalar_lea.hbm %s1692_s9, 512 }
 0x253   : > { %p1372_p13 = scmp.ne.s32.totalorder %s1641_s25, %s1371_s27  ;;  %p1376_p6 = scmp.lt.u32.totalorder %s1641_s25, %s1692_s9 }
 0x254   : > { %p1377_p9 = scmp.lt.u32.totalorder %s1375_s26, %s1371_s27  ;;  %p1379_p10 = scmp.lt.u32.totalorder %s1371_s27, %s1641_s25 }
 0x255   : > { %p1373_p0 = pnand %p1372_p13, %p1711_p1 }
 0x256   : > { %p1378_p12 = por %p1377_p9, %p1376_p6 }
 0x257   : > { %p1374_p5 = pneg %p1373_p0 }
 0x258   : > { %p1380_p2 = por %p1379_p10, %p1378_p12 }
 0x25a   : > { %p1381_p3 = pnand %p1380_p2, %p1374_p5 }
 0x25c   : > { %1384 = shalt.err (!%p1381_p3)
}
 0x25d   : > { %1161 = dma.vmem_to_hbm [thread:$0]  (%p1711_p1), %s1643_s16, 256, %s1641_s25, %s949_s23  }
 0x25e PF: > { %p1178_p4 = scmp.ge.s32.totalorder %s1427_s12, 2  ;;  %s975_s14 = sand.u32 1, %s1415_s30  }
 0x25f   : > { %p1712_p7 = scmp.ne.s32.totalorder %s1703_s20, 0  ;;  %s976_s17 = scalar_lea.sflag [#allocation4], %s975_s14 }
 0x261   : > { %p1171_p8 = pnand %p1178_p4, %p1712_p7 }
 0x263   : > { %1410 = dma.done.wait (!%p1171_p8), %s976_s17, 256  }
 0x264   : > { %1412 = vsyncadd (!%p1171_p8), %s976_s17, 4294967040  ;;  %s1713_s12 = sld [smem:[#allocation12_spill]]  ;;  %s1714_s22 = sld [smem:[#allocation11_spill]] }
 0x265   : > { %s1715_s11 = sld [smem:[#allocation13_spill]]  ;;  %s1716_s30 = smov %s1419_s10 }
 0x26a   : > { %p21_p11 = scmp.ge.s32.totalorder %s1713_s12, 4   ;;  %s1717_s10 = smov %s1714_s22 }
 0x26c   :  { %23 = sbr.rel (!%p21_p11) target bundleno = 5 (0x5), region = 102 }
 0x273   :  { %981 = vsyncpa [#allocation3], 1 }
 0x274   :  { %983 = vsyncpa [#allocation3 + $0x1], 1 }
 0x275   :  { %984 = vsyncpa [#allocation6], 1 }
 0x276   :  { %985 = vsyncpa [#allocation4], 1 }
 0x277   :  { %987 = vsyncpa [#allocation4 + $0x1], 1 }

</bundles_post_ra>
